<compile_context>
chip_gen: v7x
topology: tpu7x:2x2x1
jax: 0.10.0
libtpu: 0.0.40
codegen_flags: <defaults>
</compile_context>

<pallas_src>
import functools

import jax
import jax.numpy as jnp
from jax.experimental import pallas as pl
from jax.experimental.pallas import tpu as pltpu


def _decoder_kernel(x_ref, wx_ref, wh_ref, bh_ref, wo_ref, bo_ref, out_ref,
                    *, num_steps):
    """Full T-step recurrence in one invocation, batched epilogue.

    h_t = x @ Wx + h_{t-1} @ Wh + b_h        (h_{-1} = 0)
    y_t = log_softmax(h_t @ Wo + b_o)
    out = rows ordered t-major: out[t*B + b, :] = y_t[b, :]   (shape (T*B, V))
    """
    x = x_ref[...]
    wh = wh_ref[...]

    # Loop-invariant part of decode(): x @ Wx + b_h (x never changes across t).
    xb = jnp.dot(x, wx_ref[...], preferred_element_type=jnp.float32) + bh_ref[...]

    # Serial Wh chain only (t = 0 zero-hidden matmul skipped: h_0 == xb).
    # 'xb + dot' keeps the accumulate-into-result form for v7x's MRB.
    h = xb
    hs = [h]
    for _ in range(num_steps - 1):  # static trip count -> fully unrolled
        h = xb + jnp.dot(h, wh, preferred_element_type=jnp.float32)
        hs.append(h)

    # Stack all hidden states along SUBLANES: (T*B, H).  Cheap sublane placement,
    # not the lane-rotate concat of the previous version.
    h_all = jnp.concatenate(hs, axis=0)

    # ONE batched output projection + ONE bias add for all T steps.
    logits = jnp.dot(h_all, wo_ref[...], preferred_element_type=jnp.float32) + bo_ref[...]

    # ONE batched, numerically-stable log-softmax over the vocab axis.
    m = jnp.max(logits, axis=-1, keepdims=True)
    lse = m + jnp.log(jnp.sum(jnp.exp(logits - m), axis=-1, keepdims=True))

    # Single store of the whole (T*B, V) block.
    out_ref[...] = logits - lse


@functools.partial(jax.jit, static_argnames=("max_label_length",))
def simple_decoder_forward(x, wx, wh, bh, wo, bo, *, max_label_length):
    """Pallas implementation of SimpleDecoder.forward.

    x  : (B, input_size) float32
    wx : (input_size, hidden) -- slice of hidden_layer.weight acting on x
    wh : (hidden, hidden)     -- slice of hidden_layer.weight acting on h
    bh : (1, hidden)
    wo : (hidden, vocab)
    bo : (1, vocab)
    returns (B, max_label_length, vocab) log-probabilities.
    """
    B, _ = x.shape
    V = wo.shape[1]
    T = max_label_length

    vmem = pl.BlockSpec(memory_space=pltpu.MemorySpace.VMEM)

    out_tb = pl.pallas_call(
        functools.partial(_decoder_kernel, num_steps=T),
        out_shape=jax.ShapeDtypeStruct((T * B, V), jnp.float32),
        in_specs=[vmem] * 6,
        out_specs=vmem,
    )(x, wx, wh, bh, wo, bo)

    # Rows are t-major (row = t*B + b): reshape to (T, B, V) then swap the first two
    # axes to reproduce torch.stack(result, 1).  Tiny XLA op on 512 floats, kept out
    # of the kernel on purpose.
    return out_tb.reshape(T, B, V).transpose(1, 0, 2)


def reference_forward(x, wx, wh, bh, wo, bo, max_label_length):
    """Pure-JAX reference mirroring the PyTorch forward loop."""
    B = x.shape[0]
    H = wh.shape[0]
    h = jnp.zeros((B, H), jnp.float32)
    outs = []
    for _ in range(max_label_length):
        h = x @ wx + h @ wh + bh
        logits = h @ wo + bo
        outs.append(jax.nn.log_softmax(logits, axis=-1))
    return jnp.stack(outs, axis=1)


if __name__ == "__main__":
    # Synthetic vocabulary / sizes consistent with the module's __init__:
    #   vocabulary.size = 16, vocabulary.max_name_length = 7 -> max_label_length = 8
    #   input_size = 32, hidden_size = 64
    B = 2
    INPUT_SIZE = 32
    HIDDEN = 64
    VOCAB = 16
    MAX_LABEL_LENGTH = 8  # max_name_length + 1

    key = jax.random.PRNGKey(0)
    kx, k1, k2, k3, k4, k5 = jax.random.split(key, 6)

    x = jax.random.normal(kx, (B, INPUT_SIZE), jnp.float32)

    # hidden_layer: Linear(input_size + hidden, hidden). Split its (in, out)
    # weight into the part that multiplies x and the part that multiplies h
    # (torch.cat((x, h), -1) @ W  ==  x @ Wx + h @ Wh).
    scale_h = 1.0 / jnp.sqrt(INPUT_SIZE + HIDDEN)
    wx = jax.random.uniform(k1, (INPUT_SIZE, HIDDEN), jnp.float32, -scale_h, scale_h)
    wh = jax.random.uniform(k2, (HIDDEN, HIDDEN), jnp.float32, -scale_h, scale_h)
    bh = jax.random.uniform(k3, (1, HIDDEN), jnp.float32, -scale_h, scale_h)

    # output_layer[0]: Linear(hidden, vocab)
    scale_o = 1.0 / jnp.sqrt(HIDDEN)
    wo = jax.random.uniform(k4, (HIDDEN, VOCAB), jnp.float32, -scale_o, scale_o)
    bo = jax.random.uniform(k5, (1, VOCAB), jnp.float32, -scale_o, scale_o)

    out = simple_decoder_forward(
        x, wx, wh, bh, wo, bo, max_label_length=MAX_LABEL_LENGTH
    )
    out = jax.block_until_ready(out)

    ref = reference_forward(x, wx, wh, bh, wo, bo, MAX_LABEL_LENGTH)
    assert out.shape == (B, MAX_LABEL_LENGTH, VOCAB), out.shape
    assert jnp.allclose(out, ref, atol=5e-4, rtol=5e-4), "mismatch vs reference"

    print("KERNEL_OK")
</pallas_src>

<mosaic_0001>
module attributes {stable_mosaic.version = 11 : i64} {
  func.func @_decoder_kernel(%arg0: memref<2x32xf32, #tpu.memory_space<vmem>>, %arg1: memref<32x64xf32, #tpu.memory_space<vmem>>, %arg2: memref<64x64xf32, #tpu.memory_space<vmem>>, %arg3: memref<1x64xf32, #tpu.memory_space<vmem>>, %arg4: memref<64x16xf32, #tpu.memory_space<vmem>>, %arg5: memref<1x16xf32, #tpu.memory_space<vmem>>, %arg6: memref<16x16xf32, #tpu.memory_space<vmem>>) attributes {dimension_semantics = [], scalar_prefetch = 0 : i64, scratch_operands = 0 : i64, tpu.core_type = #tpu.core_type<tc>} {
    %c0 = arith.constant 0 : index
    %c0_0 = arith.constant 0 : index
    %0 = vector.load %arg0[%c0, %c0_0] : memref<2x32xf32, #tpu.memory_space<vmem>>, vector<2x32xf32>
    %c0_1 = arith.constant 0 : index
    %c0_2 = arith.constant 0 : index
    %1 = vector.load %arg2[%c0_1, %c0_2] : memref<64x64xf32, #tpu.memory_space<vmem>>, vector<64x64xf32>
    %c0_3 = arith.constant 0 : index
    %c0_4 = arith.constant 0 : index
    %2 = vector.load %arg1[%c0_3, %c0_4] : memref<32x64xf32, #tpu.memory_space<vmem>>, vector<32x64xf32>
    %cst = arith.constant dense<0.000000e+00> : vector<2x64xf32>
    %3 = tpu.matmul %0, %2, %cst {dimension_numbers = #tpu.dot_dimension_numbers<[1], [0], [0], [1], [0, 0, 1, 1], [], []>} : vector<2x32xf32>, vector<32x64xf32>, vector<2x64xf32> -> vector<2x64xf32>
    %c0_5 = arith.constant 0 : index
    %c0_6 = arith.constant 0 : index
    %4 = vector.load %arg3[%c0_5, %c0_6] : memref<1x64xf32, #tpu.memory_space<vmem>>, vector<1x64xf32>
    %5 = vector.broadcast %4 : vector<1x64xf32> to vector<2x64xf32>
    %6 = arith.addf %3, %5 : vector<2x64xf32>
    %cst_7 = arith.constant dense<0.000000e+00> : vector<2x64xf32>
    %7 = tpu.matmul %6, %1, %cst_7 {dimension_numbers = #tpu.dot_dimension_numbers<[1], [0], [0], [1], [0, 0, 1, 1], [], []>} : vector<2x64xf32>, vector<64x64xf32>, vector<2x64xf32> -> vector<2x64xf32>
    %8 = arith.addf %6, %7 : vector<2x64xf32>
    %cst_8 = arith.constant dense<0.000000e+00> : vector<2x64xf32>
    %9 = tpu.matmul %8, %1, %cst_8 {dimension_numbers = #tpu.dot_dimension_numbers<[1], [0], [0], [1], [0, 0, 1, 1], [], []>} : vector<2x64xf32>, vector<64x64xf32>, vector<2x64xf32> -> vector<2x64xf32>
    %10 = arith.addf %6, %9 : vector<2x64xf32>
    %cst_9 = arith.constant dense<0.000000e+00> : vector<2x64xf32>
    %11 = tpu.matmul %10, %1, %cst_9 {dimension_numbers = #tpu.dot_dimension_numbers<[1], [0], [0], [1], [0, 0, 1, 1], [], []>} : vector<2x64xf32>, vector<64x64xf32>, vector<2x64xf32> -> vector<2x64xf32>
    %12 = arith.addf %6, %11 : vector<2x64xf32>
    %cst_10 = arith.constant dense<0.000000e+00> : vector<2x64xf32>
    %13 = tpu.matmul %12, %1, %cst_10 {dimension_numbers = #tpu.dot_dimension_numbers<[1], [0], [0], [1], [0, 0, 1, 1], [], []>} : vector<2x64xf32>, vector<64x64xf32>, vector<2x64xf32> -> vector<2x64xf32>
    %14 = arith.addf %6, %13 : vector<2x64xf32>
    %cst_11 = arith.constant dense<0.000000e+00> : vector<2x64xf32>
    %15 = tpu.matmul %14, %1, %cst_11 {dimension_numbers = #tpu.dot_dimension_numbers<[1], [0], [0], [1], [0, 0, 1, 1], [], []>} : vector<2x64xf32>, vector<64x64xf32>, vector<2x64xf32> -> vector<2x64xf32>
    %16 = arith.addf %6, %15 : vector<2x64xf32>
    %cst_12 = arith.constant dense<0.000000e+00> : vector<2x64xf32>
    %17 = tpu.matmul %16, %1, %cst_12 {dimension_numbers = #tpu.dot_dimension_numbers<[1], [0], [0], [1], [0, 0, 1, 1], [], []>} : vector<2x64xf32>, vector<64x64xf32>, vector<2x64xf32> -> vector<2x64xf32>
    %18 = arith.addf %6, %17 : vector<2x64xf32>
    %cst_13 = arith.constant dense<0.000000e+00> : vector<2x64xf32>
    %19 = tpu.matmul %18, %1, %cst_13 {dimension_numbers = #tpu.dot_dimension_numbers<[1], [0], [0], [1], [0, 0, 1, 1], [], []>} : vector<2x64xf32>, vector<64x64xf32>, vector<2x64xf32> -> vector<2x64xf32>
    %20 = arith.addf %6, %19 : vector<2x64xf32>
    %21 = tpu.concatenate %6, %8, %10, %12, %14, %16, %18, %20 in 0 : vector<2x64xf32>, vector<2x64xf32>, vector<2x64xf32>, vector<2x64xf32>, vector<2x64xf32>, vector<2x64xf32>, vector<2x64xf32>, vector<2x64xf32> -> vector<16x64xf32>
    %c0_14 = arith.constant 0 : index
    %c0_15 = arith.constant 0 : index
    %22 = vector.load %arg4[%c0_14, %c0_15] : memref<64x16xf32, #tpu.memory_space<vmem>>, vector<64x16xf32>
    %cst_16 = arith.constant dense<0.000000e+00> : vector<16x16xf32>
    %23 = tpu.matmul %21, %22, %cst_16 {dimension_numbers = #tpu.dot_dimension_numbers<[1], [0], [0], [1], [0, 0, 1, 1], [], []>} : vector<16x64xf32>, vector<64x16xf32>, vector<16x16xf32> -> vector<16x16xf32>
    %c0_17 = arith.constant 0 : index
    %c0_18 = arith.constant 0 : index
    %24 = vector.load %arg5[%c0_17, %c0_18] : memref<1x16xf32, #tpu.memory_space<vmem>>, vector<1x16xf32>
    %25 = vector.broadcast %24 : vector<1x16xf32> to vector<16x16xf32>
    %26 = arith.addf %23, %25 : vector<16x16xf32>
    %cst_19 = arith.constant dense<0xFF800000> : vector<16xf32>
    %27 = vector.multi_reduction <maximumf>, %26, %cst_19 [1] : vector<16x16xf32> to vector<16xf32>
    %28 = vector.shape_cast %27 : vector<16xf32> to vector<16x1xf32>
    %29 = vector.broadcast %28 : vector<16x1xf32> to vector<16x16xf32>
    %30 = arith.subf %26, %29 : vector<16x16xf32>
    %31 = math.exp %30 : vector<16x16xf32>
    %cst_20 = arith.constant dense<0.000000e+00> : vector<16xf32>
    %32 = vector.multi_reduction <add>, %31, %cst_20 [1] : vector<16x16xf32> to vector<16xf32>
    %33 = vector.shape_cast %32 : vector<16xf32> to vector<16x1xf32>
    %34 = math.log %33 : vector<16x1xf32>
    %35 = arith.addf %28, %34 : vector<16x1xf32>
    %36 = vector.broadcast %35 : vector<16x1xf32> to vector<16x16xf32>
    %37 = arith.subf %26, %36 : vector<16x16xf32>
    %c0_21 = arith.constant 0 : index
    %c0_22 = arith.constant 0 : index
    %38 = vector.load %arg6[%c0_21, %c0_22] : memref<16x16xf32, #tpu.memory_space<vmem>>, vector<16x16xf32>
    tpu.vector_store %arg6[%c0_21, %c0_22], %37 {strides = array<i32>} : memref<16x16xf32, #tpu.memory_space<vmem>>, vector<16x16xf32>,
    return
  }
}

</mosaic_0001>

<bundles_post_ra>
// kernel: simple_decoder_forward.1
= control target key start
LH: loop header
LB: loop body
LE: loop exit
PB: predicated region body
PF: predicated region fallthrough
CT: control target
= control target key end

     0   :  { %11 = vsyncpa [#allocation3], 0  ;;  %s1199_s21 = smov [#allocation2]   ;;  %s1429_s0 = inlined_call_operand.vmem [shape: f32[2,32], index: 0, kind: input, shape index: {}]   ;;  %s1430_s1 = inlined_call_operand.hbm [shape: f32[32,64], index: 1, kind: input, shape index: {}]   ;;  %s1431_s2 = inlined_call_operand.vmem [shape: f32[64,64], index: 2, kind: input, shape index: {}]   ;;  %s1432_s3 = inlined_call_operand.vmem [shape: f32[1,64], index: 3, kind: input, shape index: {}]   ;;  %s1433_s4 = inlined_call_operand.vmem [shape: f32[64,16], index: 4, kind: input, shape index: {}]   ;;  %s1434_s5 = inlined_call_operand.vmem [shape: f32[1,16], index: 5, kind: input, shape index: {}]   ;;  %s1435_s6 = inlined_call_operand.vmem [shape: f32[16,16], index: 6, kind: output, shape index: {}]  }
   0x1   :  { %s19_s22 = sshll.u32 %s1199_s21, 4  ;;  %s1175_s25 = scalar_lea.hbm %s1430_s1, 512  ;;  %s20_s22 = int_to_ptr.vmem [resolvable:$true] %s19_s22 }
   0x2   :  { %p1176_p0 = scmp.ne.s32.totalorder %s1430_s1, %s1175_s25  ;;  %p1179_p1 = scmp.lt.u32.totalorder %s1175_s25, %s1430_s1 }
   0x4   :  { %p1181_p2 = pnand %p1179_p1, %p1176_p0 }
   0x6   :  { %1184 = shalt.err (!%p1181_p2)
}
   0x7   :  { %s1185_s30 = scalar_lea.vmem %s20_s22, 512  ;;  %p1190_p4 = scmp.lt.s32.totalorder %s20_s22, %s20_s22 }
   0x8   :  { %p1186_p3 = scmp.ne.s32.totalorder %s20_s22, %s1185_s30  ;;  %p1191_p5 = scmp.lt.s32.totalorder %s1185_s30, %s1185_s30 }
   0xa   :  { %p1192_p6 = por %p1191_p5, %p1190_p4 }
   0xc   :  { %p1193_p7 = pnand %p1192_p6, %p1186_p3 }
   0xe   :  { %1196 = shalt.err (!%p1193_p7)
}
   0xf   :  { %s1200_s7 = smov 128   ;;  %s1201_s8 = smov 8  }
  0x10   :  { %25 = dma.hbm_to_vmem [thread:$0]  %s1430_s1, 512, %s20_s22, [#allocation3], %s1200_s7, %s1200_s7, %s1201_s8  }
  0x11   :  { %1197 = dma.done.wait [#allocation3], 512  }
  0x12   :  { %1198 = vsyncadd [#allocation3], 4294966784  ;;  %v1202_v0 = vmov 0.0|0.0   ;;  %vm1203_vm0 = vmmov 0   ;;  %v1204_v1 = vmov 0.0   ;;  %v46_v2 = vld [vmem:[#allocation2] sm:$0xff] }
  0x13   :  { %1055 = vmatprep.subr.bf16.mxu0 %v1202_v0  ;;  %900 = vmatprep.mubr.msk.f32.mxu0 %vm1203_vm0, %v1204_v1  ;;  %v47_v3 = vld [vmem:[#allocation2 + $0x8] sm:$0xff]  ;;  %v48_v4 = vld [vmem:[#allocation2 + $0x10] sm:$0xff]  ;;  %v49_v6 = vld [vmem:[#allocation2 + $0x18] sm:$0xff]  ;;  %vm57_vm1 = vcmask 261120   ;;  %vm131_vm2 = vcmask 523264   ;;  %vm663_vm3 = vcmask 1041408  }
  0x14   :  { %1061 = vmatprep.subr.bf16.mxu1 %v1202_v0  ;;  %919 = vmatprep.mubr.msk.f32.mxu1 %vm1203_vm0, %v1204_v1  ;;  %v1056_v5 = vpack.c.bf16 %v47_v3, %v46_v2  ;;  %v38_v7 = vld [vmem:[%s1431_s2] sm:$0xff]  ;;  %v39_v8 = vld [vmem:[%s1431_s2 + $0x8] sm:$0xff]  ;;  %v40_v9 = vld [vmem:[%s1431_s2 + $0x10] sm:$0xff]  ;;  %v1059_v11 = vpack.c.bf16 %v49_v6, %v48_v4  ;;  %vm665_vm4 = vcmask 1043456   ;;  %vm667_vm5 = vcmask 1045504  }
  0x15   :  { %v41_v10 = vld [vmem:[%s1431_s2 + $0x18] sm:$0xff]  ;;  %v1270_v12 = vpack.c.bf16 %v39_v8, %v38_v7  ;;  %v42_v14 = vld [vmem:[%s1431_s2 + $0x20] sm:$0xff]  ;;  %v43_v15 = vld [vmem:[%s1431_s2 + $0x28] sm:$0xff]  ;;  %vm768_vm6 = vcmask 130048  }
  0x16   :  { %1057 = vmatpush3.bf16.msra.mxu0 %v1056_v5  ;;  %v1274_v13 = vpack.c.bf16 %v41_v10, %v40_v9  ;;  %v37_v16 = vld [vmem:[%s1429_s0] sm:$0x3]  ;;  %v1288_v17 = vpack.c.bf16 %v43_v15, %v42_v14  ;;  %v44_v18 = vld [vmem:[%s1431_s2 + $0x30] sm:$0xff]  ;;  %v45_v19 = vld [vmem:[%s1431_s2 + $0x38] sm:$0xff] }
  0x17   :  { %1058 = vmatprep.subr.bf16.mxu0 %v1202_v0  ;;  %1063 = vmatpush3.bf16.msra.mxu1 %v1270_v12  ;;  %v1307_v20 = vpack.c.bf16 %v45_v19, %v44_v18  ;;  %v802_v21 = vld [vmem:[%s1432_s3] ss:$0 sm:$0xff]  ;;  %v673_v47 = vld [vmem:[%s1433_s4 + $0x8] sm:$0xff]  ;;  %v674_v48 = vld [vmem:[%s1433_s4 + $0x10] sm:$0xff] }
  0x18   :  { %1064 = vmatprep.subr.bf16.mxu1 %v1202_v0  ;;  %v672_v46 = vld [vmem:[%s1433_s4] sm:$0xff]  ;;  %v675_v50 = vld [vmem:[%s1433_s4 + $0x18] sm:$0xff]  ;;  %v677_v53 = vld [vmem:[%s1433_s4 + $0x28] sm:$0xff] }
  0x19   :  { %v1145_v49 = vpack.c.bf16 %v673_v47, %v672_v46  ;;  %v1149_v51 = vpack.c.bf16 %v675_v50, %v674_v48  ;;  %v676_v52 = vld [vmem:[%s1433_s4 + $0x20] sm:$0xff]  ;;  %v678_v62 = vld [vmem:[%s1433_s4 + $0x30] sm:$0xff]  ;;  %v679_v63 = vld [vmem:[%s1433_s4 + $0x38] sm:$0xff] }
  0x1a   :  { %1060 = vmatpush3.bf16.msra.mxu0 %v1059_v11  ;;  %v1153_v54 = vpack.c.bf16 %v677_v53, %v676_v52  ;;  %v811_v6 = vld [vmem:[%s1434_s5] ss:$0 sm:$0xff] }
  0x1b   :  { %1073 = vmatprep.subr.bf16.mxu0 %v1202_v0  ;;  %1066 = vmatpush3.bf16.msra.mxu1 %v1274_v13 }
  0x1c   :  { %1067 = vmatprep.subr.bf16.mxu1 %v1202_v0 }
  0x1d   :  { %901 = vmatmul.mubr.msk.f32.vlgmr.msra.gmra.mrb[0].mxu0 %vm57_vm1, %v37_v16 }
  0x1e   :  { %1075 = vmatpush3.bf16.msra.mxu0 %v1270_v12  ;;  %938 = vmatprep.mubr.msk.f32.mxu0 %vm1203_vm0, %v1204_v1 }
  0x1f   :  { %1076 = vmatprep.subr.bf16.mxu0 %v1202_v0  ;;  %1069 = vmatpush3.bf16.msra.mxu1 %v1288_v17 }
  0x20   :  { %1070 = vmatprep.subr.bf16.mxu1 %v1202_v0 }
  0x22   :  { %1078 = vmatpush3.bf16.msra.mxu0 %v1274_v13 }
  0x23   :  { %1079 = vmatprep.subr.bf16.mxu0 %v1202_v0  ;;  %1072 = vmatpush3.bf16.msra.mxu1 %v1307_v20 }
  0x24   :  { %1085 = vmatprep.subr.bf16.mxu1 %v1202_v0 }
  0x26   :  { %1081 = vmatpush3.bf16.msra.mxu0 %v1288_v17 }
  0x27   :  { %1082 = vmatprep.subr.bf16.mxu0 %v1202_v0 }
  0x2a   :  { %1084 = vmatpush3.bf16.msra.mxu0 %v1307_v20 }
  0x2b   :  { %1097 = vmatprep.subr.bf16.mxu0 %v1202_v0 }
  0xf0   :  { %v127_v22 = vpop.f32.mrb[0].mxu0 }
  0xf1   :  { %v1316_v23 = vadd.f32 %v802_v21, %v127_v22  ;;  %v902_v24 = vpop.f32.mrb[1].mxu0 }
  0xf3   :  { %920 = vmatmul.mubr.msk.f32.vlgmr.msra.gmra.mrb[0].mxu1 %vm131_vm2, %v1316_v23 }
  0xf4   :  { %1087 = vmatpush3.bf16.msra.mxu1 %v1270_v12  ;;  %957 = vmatprep.mubr.msk.f32.mxu1 %vm1203_vm0, %v1204_v1 }
  0xf5   :  { %1088 = vmatprep.subr.bf16.mxu1 %v1202_v0 }
  0xf8   :  { %1090 = vmatpush3.bf16.msra.mxu1 %v1274_v13 }
  0xf9   :  { %1091 = vmatprep.subr.bf16.mxu1 %v1202_v0 }
  0xfc   :  { %1093 = vmatpush3.bf16.msra.mxu1 %v1288_v17 }
  0xfd   :  { %1094 = vmatprep.subr.bf16.mxu1 %v1202_v0 }
 0x100   :  { %1096 = vmatpush3.bf16.msra.mxu1 %v1307_v20 }
 0x101   :  { %1109 = vmatprep.subr.bf16.mxu1 %v1202_v0 }
 0x1c6   :  { %v201_v25 = vpop.f32.mrb[0].mxu1 }
 0x1c7   :  { %v205_v26 = vadd.f32 %v201_v25, %v1316_v23  ;;  %v921_v27 = vpop.f32.mrb[1].mxu1 }
 0x1c9   :  { %939 = vmatmul.mubr.msk.f32.vlgmr.msra.gmra.mrb[2].mxu0 %vm131_vm2, %v205_v26  ;;  %v650_v28 = vrot.slane %v205_v26, 6 }
 0x1ca   :  { %1099 = vmatpush3.bf16.msra.mxu0 %v1270_v12  ;;  %976 = vmatprep.mubr.msk.f32.mxu0 %vm1203_vm0, %v1204_v1 }
 0x1cb   :  { %1100 = vmatprep.subr.bf16.mxu0 %v1202_v0  ;;  %v664_v33 = vsel %vm663_vm3, %v1316_v23, %v650_v28 }
 0x1ce   :  { %1102 = vmatpush3.bf16.msra.mxu0 %v1274_v13 }
 0x1cf   :  { %1103 = vmatprep.subr.bf16.mxu0 %v1202_v0 }
 0x1d2   :  { %1105 = vmatpush3.bf16.msra.mxu0 %v1288_v17 }
 0x1d3   :  { %1106 = vmatprep.subr.bf16.mxu0 %v1202_v0 }
 0x1d6   :  { %1108 = vmatpush3.bf16.msra.mxu0 %v1307_v20 }
 0x1d7   :  { %1121 = vmatprep.subr.bf16.mxu0 %v1202_v0 }
 0x29c   :  { %v275_v29 = vpop.f32.mrb[2].mxu0 }
 0x29d   :  { %v279_v30 = vadd.f32 %v275_v29, %v1316_v23  ;;  %v940_v31 = vpop.f32.mrb[3].mxu0 }
 0x29f   :  { %v652_v32 = vrot.slane %v279_v30, 4  ;;  %958 = vmatmul.mubr.msk.f32.vlgmr.msra.gmra.mrb[2].mxu1 %vm131_vm2, %v279_v30 }
 0x2a0   :  { %1111 = vmatpush3.bf16.msra.mxu1 %v1270_v12  ;;  %995 = vmatprep.mubr.msk.f32.mxu1 %vm1203_vm0, %v1204_v1 }
 0x2a1   :  { %1112 = vmatprep.subr.bf16.mxu1 %v1202_v0  ;;  %v666_v34 = vsel %vm665_vm4, %v664_v33, %v652_v32 }
 0x2a4   :  { %1114 = vmatpush3.bf16.msra.mxu1 %v1274_v13 }
 0x2a5   :  { %1115 = vmatprep.subr.bf16.mxu1 %v1202_v0 }
 0x2a8   :  { %1117 = vmatpush3.bf16.msra.mxu1 %v1288_v17 }
 0x2a9   :  { %1118 = vmatprep.subr.bf16.mxu1 %v1202_v0 }
 0x2ac   :  { %1120 = vmatpush3.bf16.msra.mxu1 %v1307_v20 }
 0x2ad   :  { %1133 = vmatprep.subr.bf16.mxu1 %v1202_v0 }
 0x372   :  { %v349_v35 = vpop.f32.mrb[2].mxu1 }
 0x373   :  { %v353_v36 = vadd.f32 %v349_v35, %v1316_v23  ;;  %v959_v37 = vpop.f32.mrb[3].mxu1 }
 0x375   :  { %v654_v38 = vrot.slane %v353_v36, 2  ;;  %977 = vmatmul.mubr.msk.f32.vlgmr.msra.gmra.mrb[4].mxu0 %vm131_vm2, %v353_v36 }
 0x376   :  { %1123 = vmatpush3.bf16.msra.mxu0 %v1270_v12  ;;  %1014 = vmatprep.mubr.msk.f32.mxu0 %vm1203_vm0, %v1204_v1 }
 0x377   :  { %1124 = vmatprep.subr.bf16.mxu0 %v1202_v0  ;;  %v668_v39 = vsel %vm667_vm5, %v666_v34, %v654_v38 }
 0x37a   :  { %1126 = vmatpush3.bf16.msra.mxu0 %v1274_v13 }
 0x37b   :  { %1127 = vmatprep.subr.bf16.mxu0 %v1202_v0 }
 0x37e   :  { %1129 = vmatpush3.bf16.msra.mxu0 %v1288_v17 }
 0x37f   :  { %1130 = vmatprep.subr.bf16.mxu0 %v1202_v0 }
 0x382   :  { %1132 = vmatpush3.bf16.msra.mxu0 %v1307_v20 }
 0x383   :  { %1146 = vmatprep.subr.bf16.mxu0 %v1145_v49 }
 0x448   :  { %v423_v40 = vpop.f32.mrb[4].mxu0 }
 0x449   :  { %v427_v41 = vadd.f32 %v423_v40, %v1316_v23  ;;  %v978_v42 = vpop.f32.mrb[5].mxu0 }
 0x44b   :  { %996 = vmatmul.mubr.msk.f32.vlgmr.msra.gmra.mrb[4].mxu1 %vm131_vm2, %v427_v41 }
 0x44c   :  { %1135 = vmatpush3.bf16.msra.mxu1 %v1270_v12  ;;  %1033 = vmatprep.mubr.msk.f32.mxu1 %vm1203_vm0, %v1204_v1 }
 0x44d   :  { %1136 = vmatprep.subr.bf16.mxu1 %v1202_v0 }
 0x450   :  { %1138 = vmatpush3.bf16.msra.mxu1 %v1274_v13 }
 0x451   :  { %1139 = vmatprep.subr.bf16.mxu1 %v1202_v0 }
 0x454   :  { %1141 = vmatpush3.bf16.msra.mxu1 %v1288_v17 }
 0x455   :  { %1142 = vmatprep.subr.bf16.mxu1 %v1202_v0  ;;  %v1157_v0 = vpack.c.bf16 %v679_v63, %v678_v62 }
 0x458   :  { %1144 = vmatpush3.bf16.msra.mxu1 %v1307_v20 }
 0x51e   :  { %v497_v43 = vpop.f32.mrb[4].mxu1 }
 0x51f   :  { %v501_v44 = vadd.f32 %v497_v43, %v1316_v23  ;;  %v997_v45 = vpop.f32.mrb[5].mxu1 }
 0x521   :  { %1015 = vmatmul.mubr.msk.f32.vlgmr.msra.gmra.mrb[6].mxu0 %vm131_vm2, %v501_v44  ;;  %v656_v55 = vrot.slane %v501_v44, 6 }
 0x522   :  { %1052 = vmatprep.mubr.msk.f32.mxu0 %vm131_vm2, %v668_v39  ;;  %1148 = vmatpush3.bf16.msra.mxu0 %v1145_v49 }
 0x523   :  { %1150 = vmatprep.subr.bf16.mxu0 %v1149_v51  ;;  %v669_v60 = vsel %vm663_vm3, %v427_v41, %v656_v55 }
 0x526   :  { %1152 = vmatpush3.bf16.msra.mxu0 %v1149_v51 }
 0x527   :  { %1154 = vmatprep.subr.bf16.mxu0 %v1153_v54 }
 0x52a   :  { %1156 = vmatpush3.bf16.msra.mxu0 %v1153_v54 }
 0x52b   :  { %1158 = vmatprep.subr.bf16.mxu0 %v1157_v0 }
 0x52e   :  { %1160 = vmatpush3.bf16.msra.mxu0 %v1157_v0 }
 0x5f4   :  { %v571_v56 = vpop.f32.mrb[6].mxu0 }
 0x5f5   :  { %v575_v57 = vadd.f32 %v571_v56, %v1316_v23  ;;  %v1016_v58 = vpop.f32.mrb[7].mxu0 }
 0x5f7   :  { %v658_v59 = vrot.slane %v575_v57, 4  ;;  %1034 = vmatmul.mubr.msk.f32.vlgmr.msra.gmra.mrb[6].mxu1 %vm131_vm2, %v575_v57 }
 0x5f9   :  { %v670_v61 = vsel %vm665_vm4, %v669_v60, %v658_v59 }
 0x6ca   :  { %v645_v1 = vpop.f32.mrb[6].mxu1 }
 0x6cb   :  { %v649_v2 = vadd.f32 %v645_v1, %v1316_v23  ;;  %v1035_v3 = vpop.f32.mrb[7].mxu1 }
 0x6cd   :  { %v661_v4 = vrot.slane %v649_v2, 2 }
 0x6cf   :  { %v671_v5 = vsel %vm667_vm5, %v670_v61, %v661_v4 }
 0x6d0   :  { %1053 = vmatmul.mubr.msk.f32.vlgmr.msra.gmra.mrb[8].mxu0 %vm131_vm2, %v671_v5 }
 0x7a3   :  { %v1054_v7 = vpop.f32.mrb[8].mxu0 }
 0x7a4   :  { %v759_v8 = vpop.f32.mrb[9].mxu0  ;;  %v765_v10 = vadd.f32 %v1054_v7, %v811_v6 }
 0x7a5   :  { %v760_v9 = vadd.f32 %v811_v6, %v759_v8 }
 0x7a6   :  { %v772_v12 = vsel %vm768_vm6, %v765_v10, -inf }
 0x7a7   :  { %v769_v11 = vsel %vm768_vm6, %v760_v9, -inf }
 0x7a8   :  { %770 = vmax.xlane.f32.xlu0 %v769_v11 }
 0x7ac   :  { %773 = vmax.xlane.f32.xlu0 %v772_v12 }
 0x835   :  { %v771_v13 = vpop.xlane.xlu0 %770 }
 0x836   :  { %v775_v14 = vsub.f32 %v760_v9, %v771_v13 }
 0x838   :  { %v777_v15 = vmul.f32 1.442695, %v775_v14 }
 0x839   :  { %v774_v16 = vpop.xlane.xlu0 %773 }
 0x83a   :  { %1167 = vpow2.f32 %v777_v15  ;;  %v776_v17 = vsub.f32 %v765_v10, %v774_v16 }
 0x83c   :  { %v779_v18 = vmul.f32 1.442695, %v776_v17 }
 0x83e   :  { %1169 = vpow2.f32 %v779_v18 }
 0x844   :  { %v1168_v19 = vpop.eup %1167 }
 0x845   :  { %v781_v20 = vsel %vm768_vm6, %v1168_v19, 0.0 }
 0x846   :  { %782 = vadd.xlane.f32.xlu1 %v781_v20 }
 0x848   :  { %v1170_v21 = vpop.eup %1169 }
 0x849   :  { %v784_v22 = vsel %vm768_vm6, %v1170_v21, 0.0 }
 0x84a   :  { %785 = vadd.xlane.f32.xlu1 %v784_v22 }
 0x8d3   :  { %v783_v23 = vpop.xlane.xlu1 %782 }
 0x8d4   :  { %1171 = vlog2.f32 %v783_v23 }
 0x8d7   :  { %v786_v24 = vpop.xlane.xlu1 %785 }
 0x8d8   :  { %1173 = vlog2.f32 %v786_v24 }
 0x8de   :  { %v1172_v25 = vpop.eup %1171 }
 0x8df   :  { %v788_v26 = vmul.f32 0.6931472, %v1172_v25 }
 0x8e1   :  { %v791_v27 = vadd.f32 %v788_v26, %v771_v13 }
 0x8e2   :  { %v1174_v28 = vpop.eup %1173 }
 0x8e3   :  { %v793_v29 = vsub.f32 %v760_v9, %v791_v27  ;;  %v790_v30 = vmul.f32 0.6931472, %v1174_v28 }
 0x8e5   :  { %795 = vst.msk [vmem:[%s1435_s6] sm:$0xff] %vm768_vm6, %v793_v29  ;;  %v792_v31 = vadd.f32 %v790_v30, %v774_v16 }
 0x8e7   :  { %v794_v32 = vsub.f32 %v765_v10, %v792_v31 }
 0x8e9   :  { %796 = vst.msk [vmem:[%s1435_s6 + $0x8] sm:$0xff] %vm768_vm6, %v794_v32 }
 0x8ea   :  { %801 = vsyncpa [#allocation3], 1 }

</bundles_post_ra>
